<compile_context>
chip_gen: v7x
topology: tpu7x:2x2x1
jax: 0.10.0
libtpu: 0.0.40
codegen_flags: <defaults>
</compile_context>

<pallas_src>
import functools

import jax
import jax.numpy as jnp
from jax.experimental import pallas as pl
from jax.experimental.pallas import tpu as pltpu

_VMEM_LIMIT = 48 * 1024 * 1024            # safe on v7x (64 MiB) and v5e/v6e
_WEIGHT_RESIDENT_BYTES = 4 * 1024 * 1024  # bf16 (K,N) weight kept fully in VMEM
_DIRECT_CONV_IMG_BYTES = 12 * 1024 * 1024


def _round_up(x, m):
    return (x + m - 1) // m * m


def _pad2d(x, rows, cols):
    r, c = x.shape
    if rows != r or cols != c:
        x = jnp.pad(x, ((0, rows - r), (0, cols - c)))
    return x


# ----------------------------------------------------------------------------
# Kernel 1: matmul + fused bias, weight (K,N) fully VMEM-resident (no K grid)
# ----------------------------------------------------------------------------
def _matmul_bias_kernel(a_ref, b_ref, bias_ref, o_ref):
    o_ref[...] = (jnp.dot(a_ref[...], b_ref[...],
                          preferred_element_type=jnp.float32)
                  + bias_ref[...]).astype(o_ref.dtype)


# Fallback kernel (K tiled with an f32 accumulator) -- only used if a weight
# matrix is too large to keep resident (never the case in this network).
def _matmul_bias_acc_kernel(a_ref, b_ref, bias_ref, o_ref, acc_ref):
    @pl.when(pl.program_id(2) == 0)
    def _():
        acc_ref[...] = jnp.zeros_like(acc_ref)

    acc_ref[...] += jnp.dot(a_ref[...], b_ref[...],
                            preferred_element_type=jnp.float32)

    @pl.when(pl.program_id(2) == pl.num_programs(2) - 1)
    def _():
        o_ref[...] = (acc_ref[...] + bias_ref[...]).astype(o_ref.dtype)


def matmul_bias(a, b, bias, *, out_dtype=jnp.bfloat16, tm=512):
    """a:(M,K) @ b:(K,N) + bias:(N,) on the MXU (bf16 in, f32 accumulate)."""
    M, K = a.shape
    _, N = b.shape
    a_bf = a.astype(jnp.bfloat16)
    b_bf = b.astype(jnp.bfloat16)
    bias_f = bias.astype(jnp.float32).reshape(1, N)

    if K * N * 2 <= _WEIGHT_RESIDENT_BYTES:
        # Weight + bias resident in VMEM; single dot per grid step, direct
        # write into o_ref (no accumulator scratch, no K grid axis).
        tm_ = min(tm, _round_up(M, 8))
        Mp = _round_up(M, tm_)
        tn_ = N
        if Mp // tm_ == 1:
            # Guarantee >= 2 grid blocks so both v7x TensorCores get work.
            half_tm = _round_up((tm_ + 1) // 2, 8)
            if half_tm < tm_:
                tm_ = half_tm
                Mp = _round_up(M, tm_)
            elif N % 256 == 0:
                tn_ = N // 2
        if Mp != M:
            a_bf = jnp.pad(a_bf, ((0, Mp - M), (0, 0)))
        # N tiles on the outer axis so the resident weight block only changes
        # when the (rare) N tile changes, never across M tiles.
        grid = (N // tn_, Mp // tm_)
        out = pl.pallas_call(
            _matmul_bias_kernel,
            out_shape=jax.ShapeDtypeStruct((Mp, N), out_dtype),
            grid_spec=pltpu.PrefetchScalarGridSpec(
                num_scalar_prefetch=0,
                grid=grid,
                in_specs=[
                    pl.BlockSpec((tm_, K), lambda j, i: (i, 0)),
                    pl.BlockSpec((K, tn_), lambda j, i: (0, j)),
                    pl.BlockSpec((1, tn_), lambda j, i: (0, j)),
                ],
                out_specs=pl.BlockSpec((tm_, tn_), lambda j, i: (i, j)),
            ),
            compiler_params=pltpu.CompilerParams(
                dimension_semantics=("parallel", "parallel"),
                vmem_limit_bytes=_VMEM_LIMIT),
        )(a_bf, b_bf, bias_f)
        return out[:M] if Mp != M else out

    # ---------------- fallback: K tiled (not hit by this network) -----------
    tm_ = min(256, _round_up(M, 8))
    tn_ = min(256, _round_up(N, 128))
    tk_ = min(512, _round_up(K, 128))
    Mp, Np, Kp = _round_up(M, tm_), _round_up(N, tn_), _round_up(K, tk_)
    a_p = _pad2d(a_bf, Mp, Kp)
    b_p = _pad2d(b_bf, Kp, Np)
    bias_p = _pad2d(bias_f, 1, Np)
    out = pl.pallas_call(
        _matmul_bias_acc_kernel,
        out_shape=jax.ShapeDtypeStruct((Mp, Np), out_dtype),
        grid_spec=pltpu.PrefetchScalarGridSpec(
            num_scalar_prefetch=0,
            grid=(Mp // tm_, Np // tn_, Kp // tk_),
            in_specs=[
                pl.BlockSpec((tm_, tk_), lambda i, j, k: (i, k)),
                pl.BlockSpec((tk_, tn_), lambda i, j, k: (k, j)),
                pl.BlockSpec((1, tn_), lambda i, j, k: (0, j)),
            ],
            out_specs=pl.BlockSpec((tm_, tn_), lambda i, j, k: (i, j)),
            scratch_shapes=[pltpu.VMEM((tm_, tn_), jnp.float32)],
        ),
        compiler_params=pltpu.CompilerParams(
            dimension_semantics=("parallel", "parallel", "arbitrary"),
            vmem_limit_bytes=_VMEM_LIMIT),
    )(a_p, b_p, bias_p)
    return out[:M, :N]


# ----------------------------------------------------------------------------
# Kernel 2: direct (no-im2col) conv for large spatial kernels, stride 1.
# ----------------------------------------------------------------------------
def _direct_conv_kernel(x_ref, w_ref, bias_ref, o_ref):
    kh, kw, ci, co = w_ref.shape
    _, tr, ow, _ = o_ref.shape
    row0 = pl.program_id(1) * tr
    acc = jnp.zeros((tr * ow, co), jnp.float32)
    for ky in range(kh):
        for kx in range(kw):
            win = x_ref[0, pl.ds(row0 + ky, tr), kx:kx + ow, :]
            acc = acc + jnp.dot(win.reshape(tr * ow, ci), w_ref[ky, kx],
                                preferred_element_type=jnp.float32)
    out = acc + bias_ref[...]
    o_ref[...] = out.reshape(1, tr, ow, co).astype(o_ref.dtype)


def _conv2d_direct(x, w, b, *, pad):
    """x: (N,H,W,Cin) NHWC; w: (Cout,Cin,kh,kw) OIHW; stride 1.  f32 output."""
    Cout, Cin, kh, kw = w.shape
    N, H, W_, _ = x.shape
    OH = H + 2 * pad - kh + 1
    OW = W_ + 2 * pad - kw + 1
    Cop = _round_up(Cout, 8)
    Hp, Wp = H + 2 * pad, W_ + 2 * pad

    xp = jnp.pad(x.astype(jnp.bfloat16),
                 ((0, 0), (pad, pad), (pad, pad), (0, 0)))
    wk = jnp.transpose(w, (2, 3, 1, 0)).astype(jnp.bfloat16)   # (kh,kw,Cin,Cout)
    if Cop != Cout:
        wk = jnp.pad(wk, ((0, 0), (0, 0), (0, 0), (0, Cop - Cout)))
    bias = jnp.pad(b.astype(jnp.float32), (0, Cop - Cout)).reshape(1, Cop)

    TR = 8 if OH % 8 == 0 else OH
    R = OH // TR

    out = pl.pallas_call(
        _direct_conv_kernel,
        out_shape=jax.ShapeDtypeStruct((N, OH, OW, Cop), jnp.float32),
        grid_spec=pltpu.PrefetchScalarGridSpec(
            num_scalar_prefetch=0,
            grid=(N, R),
            in_specs=[
                # whole padded image of this batch element, resident across R
                pl.BlockSpec((1, Hp, Wp, Cin), lambda n, r: (n, 0, 0, 0)),
                pl.BlockSpec((kh, kw, Cin, Cop), lambda n, r: (0, 0, 0, 0)),
                pl.BlockSpec((1, Cop), lambda n, r: (0, 0)),
            ],
            out_specs=pl.BlockSpec((1, TR, OW, Cop), lambda n, r: (n, r, 0, 0)),
        ),
        compiler_params=pltpu.CompilerParams(
            dimension_semantics=("parallel", "parallel"),
            vmem_limit_bytes=_VMEM_LIMIT),
    )(xp, wk, bias)
    if Cop != Cout:
        out = out[..., :Cout]
    return out


# ----------------------------------------------------------------------------
# Conv via im2col + Pallas matmul (small kernels), direct kernel (9x9, Cin>=16)
# ----------------------------------------------------------------------------
def _im2col(x, kh, kw, stride, pad):
    """x: (N,H,W,C) -> patches (N*OH*OW, kh*kw*C), plus (OH, OW)."""
    N, H, W, C = x.shape
    OH = (H + 2 * pad - kh) // stride + 1
    OW = (W + 2 * pad - kw) // stride + 1
    xp = jnp.pad(x, ((0, 0), (pad, pad), (pad, pad), (0, 0))) if pad else x
    cols = []
    for ky in range(kh):
        for kx in range(kw):
            sl = xp[:, ky: ky + stride * (OH - 1) + 1: stride,
                       kx: kx + stride * (OW - 1) + 1: stride, :]
            cols.append(sl)
    patches = jnp.stack(cols, axis=3)          # (N, OH, OW, kh*kw, C)
    return patches.reshape(N * OH * OW, kh * kw * C), OH, OW


def conv2d(x, w, b, *, stride=1, pad=0, out_dtype=jnp.bfloat16):
    """x: (N,H,W,C) NHWC; w: (Cout,Cin,kh,kw) PyTorch OIHW; b: (Cout,)."""
    Cout, Cin, kh, kw = w.shape
    N, H, W_, _ = x.shape
    if (stride == 1 and kh * kw >= 25 and Cin >= 16
            and (H + 2 * pad) * (W_ + 2 * pad) * Cin * 2
            <= _DIRECT_CONV_IMG_BYTES):
        # Large-kernel stride-1 conv: no im2col blow-up (final 9x9 layer).
        return _conv2d_direct(x, w, b, pad=pad)
    patches, OH, OW = _im2col(x, kh, kw, stride, pad)
    wmat = jnp.transpose(w, (2, 3, 1, 0)).reshape(kh * kw * Cin, Cout)
    out = matmul_bias(patches, wmat, b, out_dtype=out_dtype)
    return out.reshape(N, OH, OW, Cout)


# ----------------------------------------------------------------------------
# ConvTranspose2d
#   * k=4, s=2, p=1 layers: sub-pixel (4-phase) decomposition -> one matmul
#     on the un-dilated input with a (2*2*Cin, 4*Cout) weight matrix, then an
#     interleaving reshape (bf16).
#   * generic / stride-1 layers: flipped-kernel conv (dispatches to the
#     direct kernel for the final 9x9 layer).
# ----------------------------------------------------------------------------
def _conv_transpose_s2k4p1(x, w, b):
    Cin, Cout, kh, kw = w.shape
    N, H, W_, C = x.shape
    xp = jnp.pad(x, ((0, 0), (1, 1), (1, 1), (0, 0)))
    patches, PH, PW = _im2col(xp, 2, 2, 1, 0)                 # PH=H+1, PW=W+1

    blocks = []
    for dy in range(2):
        for dx in range(2):
            sub = w[:, :, kh - 1 - dy::-2, kw - 1 - dx::-2]    # (Cin,Cout,2,2)
            blocks.append(jnp.transpose(sub, (2, 3, 0, 1)).reshape(4 * Cin, Cout))
    wmat = jnp.concatenate(blocks, axis=1)                     # (4*Cin, 4*Cout)
    bias = jnp.concatenate([b, b, b, b], axis=0)

    out = matmul_bias(patches, wmat, bias)                     # (N*PH*PW, 4*Cout) bf16
    out = out.reshape(N, PH, PW, 4, Cout)

    e00 = out[:, 0:H,     0:W_,     0]
    e01 = out[:, 0:H,     1:W_ + 1, 1]
    e10 = out[:, 1:H + 1, 0:W_,     2]
    e11 = out[:, 1:H + 1, 1:W_ + 1, 3]
    top = jnp.stack([e00, e01], axis=3)        # (N,H,W,2,Cout)  dx axis
    bot = jnp.stack([e10, e11], axis=3)
    full = jnp.stack([top, bot], axis=2)       # (N,H,2,W,2,Cout) dy axis
    return full.reshape(N, 2 * H, 2 * W_, Cout)


def conv_transpose2d(x, w, b, *, stride, pad):
    """x: (N,H,W,C) NHWC; w: (Cin,Cout,kh,kw) PyTorch ConvTranspose layout."""
    Cin, Cout, kh, kw = w.shape
    if stride == 2 and kh == 4 and kw == 4 and pad == 1:
        return _conv_transpose_s2k4p1(x, w, b)
    # Generic fallback (stride==1 path used by the final 9x9 layer).
    N, H, W_, C = x.shape
    if stride > 1:
        xd = jnp.zeros((N, (H - 1) * stride + 1, (W_ - 1) * stride + 1, C),
                       x.dtype)
        xd = xd.at[:, ::stride, ::stride, :].set(x)
    else:
        xd = x
    w_conv = jnp.transpose(w[:, :, ::-1, ::-1], (1, 0, 2, 3))  # (Cout,Cin,kh,kw)
    return conv2d(xd, w_conv, b, stride=1, pad=kh - 1 - pad)


# ----------------------------------------------------------------------------
# BatchNorm (training-mode batch stats, f32 math) + optional ReLU, bf16 out
# ----------------------------------------------------------------------------
def batchnorm_relu(x, gamma, beta, eps=1e-5, relu=True):
    xf = x.astype(jnp.float32)
    n = x.shape[0] * x.shape[1] * x.shape[2]
    mean = jnp.sum(xf, axis=(0, 1, 2)) / n
    var = jnp.sum(jnp.square(xf - mean), axis=(0, 1, 2)) / n   # centered: no cancellation
    scale = gamma * jax.lax.rsqrt(var + eps)
    shift = beta - mean * scale
    y = xf * scale + shift
    if relu:
        y = jnp.maximum(y, 0.0)
    return y.astype(x.dtype)


# ----------------------------------------------------------------------------
# Parameter init (deterministic, synthetic)
# ----------------------------------------------------------------------------
def _conv_layer(key, cout, cin, k, with_bn=True):
    kw_, kb = jax.random.split(key)
    layer = {
        "w": jax.random.normal(kw_, (cout, cin, k, k), jnp.float32)
             / jnp.sqrt(cin * k * k),
        "b": 0.01 * jax.random.normal(kb, (cout,), jnp.float32),
    }
    if with_bn:
        layer["gamma"] = jnp.ones((cout,), jnp.float32)
        layer["beta"] = jnp.zeros((cout,), jnp.float32)
    return layer


def _deconv_layer(key, cin, cout, k, with_bn=True):
    kw_, kb = jax.random.split(key)
    layer = {
        "w": jax.random.normal(kw_, (cin, cout, k, k), jnp.float32)
             / jnp.sqrt(cin * k * k),
        "b": 0.01 * jax.random.normal(kb, (cout,), jnp.float32),
    }
    if with_bn:
        layer["gamma"] = jnp.ones((cout,), jnp.float32)
        layer["beta"] = jnp.zeros((cout,), jnp.float32)
    return layer


def init_params(key):
    keys = list(jax.random.split(key, 16))
    ki = iter(keys)
    params = {
        "conv": [
            _conv_layer(next(ki), 64, 3, 9),
            _conv_layer(next(ki), 64, 64, 4),
            _conv_layer(next(ki), 128, 64, 4),
            _conv_layer(next(ki), 256, 128, 4),
        ],
        "res": [
            {"c1": _conv_layer(next(ki), 256, 256, 3),
             "c2": _conv_layer(next(ki), 256, 256, 3)}
            for _ in range(3)
        ],
        "deconv": [
            _deconv_layer(next(ki), 256, 256, 4),
            _deconv_layer(next(ki), 256, 128, 4),
            _deconv_layer(next(ki), 128, 64, 4),
            _deconv_layer(next(ki), 64, 3, 9, with_bn=False),
        ],
    }
    return params


# ----------------------------------------------------------------------------
# Forward pass (NHWC bf16 internally)
# ----------------------------------------------------------------------------
def residual_block(x, p):
    out = conv2d(x, p["c1"]["w"], p["c1"]["b"], stride=1, pad=1)
    out = batchnorm_relu(out, p["c1"]["gamma"], p["c1"]["beta"], relu=True)
    out = conv2d(out, p["c2"]["w"], p["c2"]["b"], stride=1, pad=1)
    out = batchnorm_relu(out, p["c2"]["gamma"], p["c2"]["beta"], relu=False)
    return jnp.maximum(out + x, 0).astype(x.dtype)


def cnn_forward(params, x_nchw):
    mean_image = jnp.array([0.485, 0.456, 0.406], jnp.float32).reshape(1, 3, 1, 1)
    x = x_nchw.astype(jnp.float32) - mean_image
    x = jnp.transpose(x, (0, 2, 3, 1)).astype(jnp.bfloat16)    # NCHW -> NHWC bf16

    conv_cfgs = [(9, 1, 4), (4, 2, 1), (4, 2, 1), (4, 2, 1)]
    for (k, s, p), layer in zip(conv_cfgs, params["conv"]):
        x = conv2d(x, layer["w"], layer["b"], stride=s, pad=p)
        x = batchnorm_relu(x, layer["gamma"], layer["beta"], relu=True)

    for rb in params["res"]:
        x = residual_block(x, rb)

    deconv_cfgs = [(4, 2, 1, True), (4, 2, 1, True), (4, 2, 1, True),
                   (9, 1, 4, False)]
    for (k, s, p, has_bn), layer in zip(deconv_cfgs, params["deconv"]):
        x = conv_transpose2d(x, layer["w"], layer["b"], stride=s, pad=p)
        if has_bn:
            x = batchnorm_relu(x, layer["gamma"], layer["beta"], relu=True)

    x = jnp.tanh(x.astype(jnp.float32))
    return jnp.transpose(x, (0, 3, 1, 2))  # NHWC -> NCHW, f32


# ----------------------------------------------------------------------------
# Sanity checks of the Pallas conv / deconv paths against lax references
# (scale-aware tolerance, accounts for bf16 MXU inputs / bf16 activations)
# ----------------------------------------------------------------------------
def _rel_err(got, ref):
    return float(jnp.max(jnp.abs(got - ref)) / (jnp.max(jnp.abs(ref)) + 1e-6))


def _check_conv():
    key = jax.random.PRNGKey(42)
    x = jax.random.normal(key, (2, 4, 10, 10), jnp.float32)          # NCHW
    w = jax.random.normal(jax.random.fold_in(key, 1), (6, 4, 3, 3), jnp.float32)
    b = jax.random.normal(jax.random.fold_in(key, 2), (6,), jnp.float32)
    ref = jax.lax.conv_general_dilated(
        x, w, (1, 1), [(1, 1), (1, 1)],
        dimension_numbers=("NCHW", "OIHW", "NCHW")) + b[None, :, None, None]
    got = conv2d(jnp.transpose(x, (0, 2, 3, 1)), w, b, stride=1, pad=1)
    got = jnp.transpose(got, (0, 3, 1, 2))
    assert _rel_err(got, ref) < 2e-2, "conv mismatch"


def _check_conv_direct():
    key = jax.random.PRNGKey(3)
    x = jax.random.normal(key, (2, 32, 16, 16), jnp.float32)         # NCHW
    w = jax.random.normal(jax.random.fold_in(key, 1), (5, 32, 9, 9), jnp.float32)
    b = jax.random.normal(jax.random.fold_in(key, 2), (5,), jnp.float32)
    ref = jax.lax.conv_general_dilated(
        x, w, (1, 1), [(4, 4), (4, 4)],
        dimension_numbers=("NCHW", "OIHW", "NCHW")) + b[None, :, None, None]
    got = conv2d(jnp.transpose(x, (0, 2, 3, 1)), w, b, stride=1, pad=4)
    got = jnp.transpose(got, (0, 3, 1, 2))
    assert got.shape == ref.shape, "direct conv shape mismatch"
    assert _rel_err(got, ref) < 2e-2, "direct conv mismatch"


def _check_deconv():
    key = jax.random.PRNGKey(7)
    x = jax.random.normal(key, (2, 8, 6, 6), jnp.float32)            # NCHW
    w = jax.random.normal(jax.random.fold_in(key, 1), (8, 5, 4, 4), jnp.float32)
    b = jax.random.normal(jax.random.fold_in(key, 2), (5,), jnp.float32)
    w_conv = jnp.transpose(w[:, :, ::-1, ::-1], (1, 0, 2, 3))        # (Cout,Cin,4,4)
    ref = jax.lax.conv_general_dilated(
        x, w_conv, window_strides=(1, 1), padding=[(2, 2), (2, 2)],
        lhs_dilation=(2, 2),
        dimension_numbers=("NCHW", "OIHW", "NCHW")) + b[None, :, None, None]
    got = conv_transpose2d(jnp.transpose(x, (0, 2, 3, 1)), w, b, stride=2, pad=1)
    got = jnp.transpose(got, (0, 3, 1, 2))
    assert got.shape == ref.shape, "deconv shape mismatch"
    assert _rel_err(got, ref) < 2e-2, "deconv mismatch"


if __name__ == "__main__":
    key = jax.random.PRNGKey(0)
    params = init_params(key)
    x = jax.random.normal(jax.random.fold_in(key, 999), (2, 3, 16, 16),
                          jnp.float32)

    _check_conv()
    _check_conv_direct()
    _check_deconv()

    fwd = jax.jit(functools.partial(cnn_forward, params))
    y = fwd(x)
    jax.block_until_ready(y)
    assert y.shape == (2, 3, 16, 16) and y.dtype == jnp.float32
    assert bool(jnp.all(jnp.isfinite(y)))

    print("KERNEL_OK")
</pallas_src>

<mosaic_0001>
module attributes {stable_mosaic.version = 11 : i64} {
  func.func @_matmul_bias_kernel(%arg0: i32, %arg1: i32, %arg2: memref<104x36xbf16, #tpu.memory_space<vmem>>, %arg3: memref<36x6xbf16, #tpu.memory_space<vmem>>, %arg4: memref<1x6xf32, #tpu.memory_space<vmem>>, %arg5: memref<104x6xbf16, #tpu.memory_space<vmem>>) attributes {dimension_semantics = [#tpu.dimension_semantics<parallel>, #tpu.dimension_semantics<parallel>], iteration_bounds = array<i64: 1, 2>, scalar_prefetch = 0 : i64, scratch_operands = 0 : i64, tpu.core_type = #tpu.core_type<tc>, window_params = [{transform_indices = @transform_0, window_bounds = array<i64: 104, 36>}, {transform_indices = @transform_1, window_bounds = array<i64: 36, 6>}, {transform_indices = @transform_2, window_bounds = array<i64: 1, 6>}, {transform_indices = @transform_3, window_bounds = array<i64: 104, 6>}]} {
    %c0 = arith.constant 0 : index
    %c0_0 = arith.constant 0 : index
    %0 = vector.load %arg2[%c0, %c0_0] : memref<104x36xbf16, #tpu.memory_space<vmem>>, vector<104x36xbf16>
    %c0_1 = arith.constant 0 : index
    %c0_2 = arith.constant 0 : index
    %1 = vector.load %arg3[%c0_1, %c0_2] : memref<36x6xbf16, #tpu.memory_space<vmem>>, vector<36x6xbf16>
    %cst = arith.constant dense<0.000000e+00> : vector<104x6xf32>
    %2 = tpu.matmul %0, %1, %cst {dimension_numbers = #tpu.dot_dimension_numbers<[1], [0], [0], [1], [0, 0, 1, 1], [], []>} : vector<104x36xbf16>, vector<36x6xbf16>, vector<104x6xf32> -> vector<104x6xf32>
    %c0_3 = arith.constant 0 : index
    %c0_4 = arith.constant 0 : index
    %3 = vector.load %arg4[%c0_3, %c0_4] : memref<1x6xf32, #tpu.memory_space<vmem>>, vector<1x6xf32>
    %4 = vector.broadcast %3 : vector<1x6xf32> to vector<104x6xf32>
    %5 = arith.addf %2, %4 : vector<104x6xf32>
    %6 = arith.truncf %5 : vector<104x6xf32> to vector<104x6xbf16>
    %c0_5 = arith.constant 0 : index
    %c0_6 = arith.constant 0 : index
    %7 = vector.load %arg5[%c0_5, %c0_6] : memref<104x6xbf16, #tpu.memory_space<vmem>>, vector<104x6xbf16>
    tpu.vector_store %arg5[%c0_5, %c0_6], %6 {strides = array<i32>} : memref<104x6xbf16, #tpu.memory_space<vmem>>, vector<104x6xbf16>,
    return
  }
  func.func @transform_0(%arg0: i32, %arg1: i32) -> (i32, i32) {
    %c0_i32 = arith.constant 0 : i32
    %c0_i32_0 = arith.constant 0 : i32
    return %arg1, %c0_i32 : i32, i32
  }
  func.func @transform_1(%arg0: i32, %arg1: i32) -> (i32, i32) {
    %c0_i32 = arith.constant 0 : i32
    %c0_i32_0 = arith.constant 0 : i32
    return %c0_i32, %arg0 : i32, i32
  }
  func.func @transform_2(%arg0: i32, %arg1: i32) -> (i32, i32) {
    %c0_i32 = arith.constant 0 : i32
    %c0_i32_0 = arith.constant 0 : i32
    return %c0_i32, %arg0 : i32, i32
  }
  func.func @transform_3(%arg0: i32, %arg1: i32) -> (i32, i32) {
    %c0_i32 = arith.constant 0 : i32
    return %arg1, %arg0 : i32, i32
  }
}

</mosaic_0001>

<bundles_post_ra>
// kernel: tpu_custom_call.1
= control target key start
LH: loop header
LB: loop body
LE: loop exit
PB: predicated region body
PF: predicated region fallthrough
CT: control target
= control target key end

     0   :  { %s769_s12 = smov 0   ;;  %s771_s13 = smov 0   ;;  %s881_s0 = inlined_call_operand.vmem [shape: bf16[208,36], index: 0, kind: input, shape index: {}]   ;;  %s882_s1 = inlined_call_operand.vmem [shape: bf16[36,6], index: 1, kind: input, shape index: {}]   ;;  %s883_s2 = inlined_call_operand.vmem [shape: f32[1,6], index: 2, kind: input, shape index: {}]   ;;  %s884_s3 = inlined_call_operand.vmem [shape: bf16[208,6], index: 3, kind: output, shape index: {}]  }
   0x1   :  { %s773_s14 = smov 0  }
   0x2 LB: > { %s22_s15 = sadd.s32 1, %s741_s13  ;;  %p588_p0 = scmp.ge.s32.totalorder %s745_s14, 1  ;;  %s745_s14 = sphi %s773_s14, %s13_s14   ;;  %s741_s13 = sphi %s771_s13, %s886_s13   ;;  %s737_s12 = sphi %s769_s12, %s885_s12  }
   0x3   : > { %p23_p1 = scmp.ge.s32.totalorder %s22_s15, 2  ;;  %p169_p2 = scmp.lt.s32.totalorder %s745_s14, 3 }
   0x5   : > { %s888_s15 = smov (%p23_p1, %s22_s15), 0  ;;  %p170_p3 = pnand %p588_p0, %p169_p2 }
   0x6   : > { %v713_v0 = vld [vmem:[%s882_s1] sm:$0xff] (!%p170_p3)   ;;  %v747_v1 = vmov (!%p170_p3), 0.0   ;;  %v714_v2 = vld [vmem:[%s882_s1 + $0x8] sm:$0xff] (!%p170_p3)   ;;  %v715_v3 = vld [vmem:[%s882_s1 + $0x10] ss:$0 sps:$4 sm:$0x33] (!%p170_p3)  }
   0x7   : > { %173 = sbr.rel (%p170_p3) target bundleno = 262 (0x106), region = 32  ;;  %647 = vmatprep.subr.bf16.mxu0 (!%p170_p3), %v747_v1  ;;  %681 = vmatprep.subr.bf16.mxu1 (!%p170_p3), %v747_v1  ;;  %vm321_vm0 = vcmask (!%p170_p3), 1041408   ;;  %vm748_vm1 = vmmov (!%p170_p3), 0   ;;  %vm299_vm2 = vcmask (!%p170_p3), 293888   ;;  %v824_v12 = vld [vmem:[%s883_s2] ss:$0 sm:$0xff] (!%p170_p3) }
   0x8   : > { %648 = vmatpush3.bf16.msra.mxu0 (!%p170_p3), %v713_v0  ;;  %684 = vmatpush3.bf16.msra.mxu1 (!%p170_p3), %v713_v0  ;;  %s203_s22 = smul.u32 (!%p170_p3), 13, %s737_s12  ;;  %v323_v4 = vsel (!%p170_p3), %vm321_vm0, %v715_v3, 0  ;;  %vm466_vm3 = vcmask (!%p170_p3), 44032  }
   0x9   : > { %649 = vmatprep.subr.bf16.mxu0 (!%p170_p3), %v747_v1  ;;  %682 = vmatprep.subr.bf16.mxu1 (!%p170_p3), %v747_v1 }
   0xa   : > { %653 = vmatprep.mubr.msk.bf16.mxu0 (!%p170_p3), %vm748_vm1, %v747_v1  ;;  %669 = vmatprep.mubr.msk.bf16.mxu1 (!%p170_p3), %vm748_vm1, %v747_v1  ;;  %p204_p4 = scmp.lt.s32.totalorder (!%p170_p3), %s203_s22, 25 }
   0xc   : > { %650 = vmatpush3.bf16.msra.mxu0 (!%p170_p3), %v714_v2  ;;  %685 = vmatpush3.bf16.msra.mxu1 (!%p170_p3), %v714_v2 }
   0xd   : > { %651 = vmatprep.subr.bf16.mxu0 (!%p170_p3), %v747_v1  ;;  %683 = vmatprep.subr.bf16.mxu1 (!%p170_p3), %v747_v1 }
   0xe   : > { %s890_s22 = smov (!%p204_p4, %s203_s22), 25 }
   0xf   : > { %s589_s23 = sshll.u32 %s890_s22, 2 }
  0x10   : > { %652 = vmatpush3.bf16.msra.mxu0 %v323_v4  ;;  %s207_s26 = scalar_lea.vmem %s881_s0, %s589_s23  ;;  %686 = vmatpush3.bf16.msra.mxu1 %v323_v4  ;;  %s832_s4 = scalar_lea.vmem %s884_s3, %s589_s23 }
  0x11   : > { %v716_v5 = vld [vmem:[%s207_s26] sm:$0xff]   ;;  %v718_v7 = vld [vmem:[%s207_s26 + $0x8] sm:$0xff]   ;;  %v720_v9 = vld [vmem:[%s207_s26 + $0x10] sm:$0xff]  }
  0x12   : > { %v717_v6 = vld [vmem:[%s207_s26 + $0x20] sm:$0xff]   ;;  %v719_v8 = vld [vmem:[%s207_s26 + $0x28] sm:$0xff]   ;;  %v721_v10 = vld [vmem:[%s207_s26 + $0x30] ss:$0 sps:$4 sm:$0xff]  }
  0x13   : > { %654 = vmatmul.mubr.msk.bf16.vlgmr.msra.gmra.mrb[0].mxu0 %vm299_vm2, %v716_v5  ;;  %670 = vmatmul.mubr.msk.bf16.vlgmr.msra.gmra.mrb[0].mxu1 %vm299_vm2, %v717_v6  ;;  %v722_v11 = vld [vmem:[%s207_s26 + $0x18] sm:$0xff]  }
  0x14   : > { %657 = vmatprep.mubr.msk.bf16.mxu0 %vm748_vm1, %v747_v1  ;;  %673 = vmatprep.mubr.msk.bf16.mxu1 %vm748_vm1, %v747_v1 }
  0x1b   : > { %658 = vmatmul.mubr.msk.bf16.gmra.mrb[4].mxu0 %vm299_vm2, %v718_v7  ;;  %674 = vmatmul.mubr.msk.bf16.gmra.mrb[4].mxu1 %vm299_vm2, %v719_v8 }
  0x1c   : > { %661 = vmatprep.mubr.msk.bf16.mxu0 %vm748_vm1, %v747_v1  ;;  %677 = vmatprep.mubr.msk.bf16.mxu1 %vm748_vm1, %v747_v1 }
  0x23   : > { %662 = vmatmul.mubr.msk.bf16.gmra.mrb[8].mxu0 %vm299_vm2, %v720_v9  ;;  %678 = vmatmul.mubr.msk.bf16.gmra.mrb[8].mxu1 %vm299_vm2, %v721_v10 }
  0x24   : > { %665 = vmatprep.mubr.msk.bf16.mxu0 %vm748_vm1, %v747_v1 }
  0x2b   : > { %666 = vmatmul.mubr.msk.bf16.gmra.mrb[12].mxu0 %vm299_vm2, %v722_v11 }
  0xe6   : > { %v359_v13 = vpop.f32.mrb[0].mxu0  ;;  %v391_v16 = vpop.f32.mrb[0].mxu1 }
  0xe7   : > { %v360_v14 = vadd.f32 %v824_v12, %v359_v13  ;;  %v655_v15 = vpop.f32.mrb[1].mxu0  ;;  %v392_v18 = vadd.f32 %v824_v12, %v391_v16  ;;  %v671_v19 = vpop.f32.mrb[1].mxu1 }
  0xe8   : > { %v362_v17 = vpop.f32.mrb[2].mxu0  ;;  %v394_v23 = vpop.f32.mrb[2].mxu1 }
  0xe9   : > { %v624_v20 = vpack.c.bf16 %v360_v14, %v360_v14  ;;  %v363_v21 = vadd.f32 %v824_v12, %v362_v17  ;;  %v656_v22 = vpop.f32.mrb[3].mxu0  ;;  %v632_v24 = vpack.c.bf16 %v392_v18, %v392_v18  ;;  %v395_v25 = vadd.f32 %v824_v12, %v394_v23  ;;  %v672_v26 = vpop.f32.mrb[3].mxu1 }
  0xeb   : > { %467 = vst.msk [vmem:[%s832_s4] sm:$0xf] %vm466_vm3, %v624_v20  ;;  %v625_v27 = vpack.c.bf16 %v363_v21, %v363_v21  ;;  %475 = vst.msk [vmem:[%s832_s4 + $0x20] sm:$0xf] %vm466_vm3, %v632_v24  ;;  %v633_v28 = vpack.c.bf16 %v395_v25, %v395_v25 }
  0xed   : > { %468 = vst.msk [vmem:[%s832_s4 + $0x4] sm:$0xf] %vm466_vm3, %v625_v27  ;;  %476 = vst.msk [vmem:[%s832_s4 + $0x24] sm:$0xf] %vm466_vm3, %v633_v28 }
  0xee   : > { %v367_v29 = vpop.f32.mrb[4].mxu0  ;;  %v399_v32 = vpop.f32.mrb[4].mxu1 }
  0xef   : > { %v368_v30 = vadd.f32 %v824_v12, %v367_v29  ;;  %v659_v31 = vpop.f32.mrb[5].mxu0  ;;  %v400_v34 = vadd.f32 %v824_v12, %v399_v32  ;;  %v675_v35 = vpop.f32.mrb[5].mxu1 }
  0xf0   : > { %v370_v33 = vpop.f32.mrb[6].mxu0  ;;  %v402_v39 = vpop.f32.mrb[6].mxu1 }
  0xf1   : > { %v626_v36 = vpack.c.bf16 %v368_v30, %v368_v30  ;;  %v371_v37 = vadd.f32 %v824_v12, %v370_v33  ;;  %v660_v38 = vpop.f32.mrb[7].mxu0  ;;  %v634_v40 = vpack.c.bf16 %v400_v34, %v400_v34  ;;  %v403_v41 = vadd.f32 %v824_v12, %v402_v39  ;;  %v676_v42 = vpop.f32.mrb[7].mxu1 }
  0xf3   : > { %469 = vst.msk [vmem:[%s832_s4 + $0x8] sm:$0xf] %vm466_vm3, %v626_v36  ;;  %v627_v43 = vpack.c.bf16 %v371_v37, %v371_v37  ;;  %477 = vst.msk [vmem:[%s832_s4 + $0x28] sm:$0xf] %vm466_vm3, %v634_v40  ;;  %v635_v44 = vpack.c.bf16 %v403_v41, %v403_v41 }
  0xf5   : > { %470 = vst.msk [vmem:[%s832_s4 + $0xc] sm:$0xf] %vm466_vm3, %v627_v43  ;;  %478 = vst.msk [vmem:[%s832_s4 + $0x2c] sm:$0xf] %vm466_vm3, %v635_v44 }
  0xf6   : > { %v375_v45 = vpop.f32.mrb[8].mxu0  ;;  %v407_v48 = vpop.f32.mrb[8].mxu1 }
  0xf7   : > { %v376_v46 = vadd.f32 %v824_v12, %v375_v45  ;;  %v663_v47 = vpop.f32.mrb[9].mxu0  ;;  %v408_v50 = vadd.f32 %v824_v12, %v407_v48  ;;  %v679_v51 = vpop.f32.mrb[9].mxu1 }
  0xf8   : > { %v378_v49 = vpop.f32.mrb[10].mxu0  ;;  %v410_v55 = vpop.f32.mrb[10].mxu1 }
  0xf9   : > { %v628_v52 = vpack.c.bf16 %v376_v46, %v376_v46  ;;  %v379_v53 = vadd.f32 %v824_v12, %v378_v49  ;;  %v664_v54 = vpop.f32.mrb[11].mxu0  ;;  %v636_v56 = vpack.c.bf16 %v408_v50, %v408_v50  ;;  %v680_v57 = vpop.f32.mrb[11].mxu1 }
  0xfb   : > { %471 = vst.msk [vmem:[%s832_s4 + $0x10] sm:$0xf] %vm466_vm3, %v628_v52  ;;  %v629_v58 = vpack.c.bf16 %v379_v53, %v379_v53  ;;  %479 = vst.msk [vmem:[%s832_s4 + $0x30] sm:$0xf] %vm466_vm3, %v636_v56 }
  0xfd   : > { %472 = vst.msk [vmem:[%s832_s4 + $0x14] sm:$0xf] %vm466_vm3, %v629_v58 }
  0xfe   : > { %v383_v59 = vpop.f32.mrb[12].mxu0 }
  0xff   : > { %v384_v60 = vadd.f32 %v824_v12, %v383_v59  ;;  %v667_v61 = vpop.f32.mrb[13].mxu0 }
 0x100   : > { %v386_v62 = vpop.f32.mrb[14].mxu0 }
 0x101   : > { %v630_v63 = vpack.c.bf16 %v384_v60, %v384_v60  ;;  %v387_v0 = vadd.f32 %v824_v12, %v386_v62  ;;  %v668_v1 = vpop.f32.mrb[15].mxu0 }
 0x103   : > { %473 = vst.msk [vmem:[%s832_s4 + $0x18] sm:$0xf] %vm466_vm3, %v630_v63  ;;  %v631_v2 = vpack.c.bf16 %v387_v0, %v387_v0 }
 0x105   : > { %474 = vst.msk [vmem:[%s832_s4 + $0x1c] sm:$0xf] %vm466_vm3, %v631_v2 }
 0x106 PF: > { %s13_s14 = sadd.s32 1, %s745_s14   ;;  %s885_s12 = smov %s741_s13 }
 0x107   : > { %p10_p5 = scmp.ge.s32.totalorder %s13_s14, 4   ;;  %s886_s13 = smov %s888_s15 }
 0x109   :  { %12 = sbr.rel (!%p10_p5) target bundleno = 2 (0x2), region = 68 }

</bundles_post_ra>
